<compile_context>
chip_gen: v7x
topology: tpu7x:2x2x1
jax: 0.10.0
libtpu: 0.0.40
codegen_flags: <defaults>
</compile_context>

<pallas_src>
import functools

import jax
import jax.numpy as jnp
from jax.experimental import pallas as pl
from jax.experimental.pallas import tpu as pltpu


def _convlstm_kernel(patch_ref, w_ref, b_ref, cprev_ref, h_ref, c_ref, *, Ch):
    """Single-block kernel (entire batch resident in VMEM).

    patch_ref : (K, B*N)    im2col patches, K = kH*kW*Cin, N = H*W
    w_ref     : (4*Ch, K)   conv weight; rows = out channel, cols = (tap, cin)
    b_ref     : (4*Ch, 1)   conv bias
    cprev_ref : (Ch, B*N)   previous cell state
    h_ref     : (Ch, B*N)   new hidden state (output)
    c_ref     : (Ch, B*N)   new cell state (output, HBM-aliased with cprev)
    """
    # One MXU matmul for the whole batch: (4*Ch, K) @ (K, B*N).
    acc = jnp.dot(w_ref[...], patch_ref[...],
                  preferred_element_type=jnp.float32)            # (4*Ch, B*N)
    # VPU broadcasts the (4*Ch, 1) bias column along lanes.
    acc = acc + b_ref[...].astype(jnp.float32)

    # Gate row order matches torch.split: [0:Ch)=i, [Ch:2Ch)=f, [2Ch:3Ch)=o,
    # [3Ch:4Ch)=g.  i/f/o share one contiguous full-width sigmoid slab.
    sig = jax.nn.sigmoid(acc[:3 * Ch, :])                        # (3*Ch, B*N)
    g = jnp.tanh(acc[3 * Ch:, :])                                # (Ch,   B*N)
    i_g = sig[0 * Ch:1 * Ch, :]
    f_g = sig[1 * Ch:2 * Ch, :]
    o_g = sig[2 * Ch:3 * Ch, :]

    c_prev = cprev_ref[...].astype(jnp.float32)                  # (Ch, B*N)
    c_cur = f_g * c_prev + i_g * g
    h_cur = o_g * jnp.tanh(c_cur)

    h_ref[...] = h_cur.astype(h_ref.dtype)
    c_ref[...] = c_cur.astype(c_ref.dtype)


def conv_lstm_cell_nchw(x, h_prev, c_prev, weight_oihw, bias):
    """ConvLSTM cell forward, NCHW in / NCHW out (matches the PyTorch module).

    x          : (B, Cx, H, W)
    h_prev     : (B, Ch, H, W)
    c_prev     : (B, Ch, H, W)
    weight_oihw: (4*Ch, Cx+Ch, kH, kW)   (PyTorch Conv2d weight layout)
    bias       : (4*Ch,)
    returns (h_cur, c_cur), each (B, Ch, H, W).
    """
    B, Cx, H, W = x.shape
    Ch = h_prev.shape[1]
    C4, Cin, kH, kW = weight_oihw.shape
    assert Cin == Cx + Ch and C4 == 4 * Ch
    # k//2 padding reproduces 'same' output size only for odd kernel sizes
    # (same behavior as the PyTorch module, which also uses k//2 padding).
    assert kH % 2 == 1 and kW % 2 == 1
    ph, pw = kH // 2, kW // 2
    N = H * W
    BN = B * N
    K = kH * kW * Cin

    # im2col (fused into the pallas_call input via allow_input_fusion):
    #   patches[(kh*kW+kw)*Cin + c, b*N + y*W + x] = comb_pad[b, c, y+kh, x+kw]
    combined = jnp.concatenate([x, h_prev], axis=1)               # (B, Cin, H, W)
    comb_pad = jnp.pad(combined, ((0, 0), (0, 0), (ph, ph), (pw, pw)))
    taps = [comb_pad[:, :, kh:kh + H, kw:kw + W]
            for kh in range(kH) for kw in range(kW)]              # each (B, Cin, H, W)
    patches = (jnp.stack(taps, axis=0)                            # (T, B, Cin, H, W)
               .transpose(0, 2, 1, 3, 4)                          # (T, Cin, B, H, W)
               .reshape(K, BN))                                   # (K, B*N)

    # Single 2-D weight tile: w2d[m, (kh*kW+kw)*Cin + c] = weight[m, c, kh, kw].
    w2d = jnp.transpose(weight_oihw, (0, 2, 3, 1)).reshape(C4, K)
    bias2d = bias.astype(jnp.float32).reshape(C4, 1)
    # Cell state laid out channels-in-sublanes, (b, y, x) in lanes.
    cprev2d = jnp.transpose(c_prev, (1, 0, 2, 3)).reshape(Ch, BN)

    kernel = functools.partial(_convlstm_kernel, Ch=Ch)
    h2d, c2d = pl.pallas_call(
        kernel,
        out_shape=(jax.ShapeDtypeStruct((Ch, BN), x.dtype),
                   jax.ShapeDtypeStruct((Ch, BN), x.dtype)),
        grid_spec=pltpu.PrefetchScalarGridSpec(
            num_scalar_prefetch=0,
            grid=(1,),                                 # whole problem = one block
            in_specs=[
                pl.BlockSpec((K, BN), lambda i: (0, 0)),
                pl.BlockSpec((C4, K), lambda i: (0, 0)),
                pl.BlockSpec((C4, 1), lambda i: (0, 0)),
                pl.BlockSpec((Ch, BN), lambda i: (0, 0)),
            ],
            out_specs=[
                pl.BlockSpec((Ch, BN), lambda i: (0, 0)),
                pl.BlockSpec((Ch, BN), lambda i: (0, 0)),
            ],
        ),
        # c_prev (input 3) HBM buffer reused for c_out (output 1).
        input_output_aliases={3: 1},
        compiler_params=pltpu.CompilerParams(
            dimension_semantics=("arbitrary",),
            # Let the im2col producer fuse into the kernel's patches operand
            # so the 9x-expanded tensor doesn't round-trip HBM.
            allow_input_fusion=[True, False, False, False],
        ),
    )(patches, w2d, bias2d, cprev2d)

    h_out = h2d.reshape(Ch, B, H, W).transpose(1, 0, 2, 3)
    c_out = c2d.reshape(Ch, B, H, W).transpose(1, 0, 2, 3)
    return h_out, c_out


def _reference_nchw(x, h_prev, c_prev, weight_oihw, bias):
    """Pure-JAX reference (lax conv, NCHW) for correctness checking."""
    kH, kW = weight_oihw.shape[2], weight_oihw.shape[3]
    combined = jnp.concatenate([x, h_prev], axis=1)
    out = jax.lax.conv_general_dilated(
        combined, weight_oihw,
        window_strides=(1, 1),
        padding=[(kH // 2, kH // 2), (kW // 2, kW // 2)],
        dimension_numbers=("NCHW", "OIHW", "NCHW"),
        precision=jax.lax.Precision.HIGHEST)
    out = out + bias[None, :, None, None]
    cc_i, cc_f, cc_o, cc_g = jnp.split(out, 4, axis=1)
    i = jax.nn.sigmoid(cc_i)
    f = jax.nn.sigmoid(cc_f)
    o = jax.nn.sigmoid(cc_o)
    g = jnp.tanh(cc_g)
    c_cur = f * c_prev + i * g
    h_cur = o * jnp.tanh(c_cur)
    return h_cur, c_cur


if __name__ == "__main__":
    # Module config: in_size=(16,16), in_dim=4, h_dim=8, kernel_size=(3,3), bias=True
    B, H, W = 2, 16, 16
    in_dim, h_dim = 4, 8
    kH, kW = 3, 3

    key = jax.random.PRNGKey(0)
    kx, kh, kc, kw_, kb = jax.random.split(key, 5)

    x = jax.random.normal(kx, (B, in_dim, H, W), jnp.float32)            # NCHW
    h_prev = jax.random.normal(kh, (B, h_dim, H, W), jnp.float32)        # NCHW
    c_prev = jax.random.normal(kc, (B, h_dim, H, W), jnp.float32)        # NCHW
    # Deterministic synthetic parameters (PyTorch Conv2d weight/bias shapes).
    weight = 0.1 * jax.random.normal(kw_, (4 * h_dim, in_dim + h_dim, kH, kW),
                                     jnp.float32)                        # OIHW
    bias = 0.1 * jax.random.normal(kb, (4 * h_dim,), jnp.float32)

    fwd = jax.jit(conv_lstm_cell_nchw)
    h_out, c_out = fwd(x, h_prev, c_prev, weight, bias)
    jax.block_until_ready((h_out, c_out))

    # Correctness check against the pure-JAX (Precision.HIGHEST) reference.
    # Tolerance 1e-3: the in-kernel MXU matmul uses the default f32 multi-pass
    # scheme, which differs slightly from HIGHEST at K=108.
    h_ref, c_ref = _reference_nchw(x, h_prev, c_prev, weight, bias)
    assert h_out.shape == (B, h_dim, H, W) and c_out.shape == (B, h_dim, H, W)
    assert jnp.allclose(h_out, h_ref, atol=1e-3, rtol=1e-3), \
        float(jnp.max(jnp.abs(h_out - h_ref)))
    assert jnp.allclose(c_out, c_ref, atol=1e-3, rtol=1e-3), \
        float(jnp.max(jnp.abs(c_out - c_ref)))

    print("KERNEL_OK")
</pallas_src>

<mosaic_0001>
module attributes {stable_mosaic.version = 11 : i64} {
  func.func @_convlstm_kernel(%arg0: i32, %arg1: memref<108x512xf32, #tpu.memory_space<vmem>>, %arg2: memref<32x108xf32, #tpu.memory_space<vmem>>, %arg3: memref<32x1xf32, #tpu.memory_space<vmem>>, %arg4: memref<8x512xf32, #tpu.memory_space<vmem>>, %arg5: memref<8x512xf32, #tpu.memory_space<vmem>>, %arg6: memref<8x512xf32, #tpu.memory_space<vmem>>) attributes {dimension_semantics = [#tpu.dimension_semantics<arbitrary>], iteration_bounds = array<i64: 1>, scalar_prefetch = 0 : i64, scratch_operands = 0 : i64, tpu.core_type = #tpu.core_type<tc>, window_params = [{pipeline_mode = #tpu.pipeline_mode<synchronous>, transform_indices = @transform_0, window_bounds = array<i64: 108, 512>}, {pipeline_mode = #tpu.pipeline_mode<synchronous>, transform_indices = @transform_1, window_bounds = array<i64: 32, 108>}, {pipeline_mode = #tpu.pipeline_mode<synchronous>, transform_indices = @transform_2, window_bounds = array<i64: 32, 1>}, {pipeline_mode = #tpu.pipeline_mode<synchronous>, transform_indices = @transform_3, window_bounds = array<i64: 8, 512>}, {pipeline_mode = #tpu.pipeline_mode<synchronous>, transform_indices = @transform_4, window_bounds = array<i64: 8, 512>}, {pipeline_mode = #tpu.pipeline_mode<synchronous>, transform_indices = @transform_5, window_bounds = array<i64: 8, 512>}]} {
    %c0 = arith.constant 0 : index
    %c0_0 = arith.constant 0 : index
    %0 = vector.load %arg2[%c0, %c0_0] : memref<32x108xf32, #tpu.memory_space<vmem>>, vector<32x108xf32>
    %c0_1 = arith.constant 0 : index
    %c0_2 = arith.constant 0 : index
    %1 = vector.load %arg1[%c0_1, %c0_2] : memref<108x512xf32, #tpu.memory_space<vmem>>, vector<108x512xf32>
    %cst = arith.constant dense<0.000000e+00> : vector<32x512xf32>
    %2 = tpu.matmul %0, %1, %cst {dimension_numbers = #tpu.dot_dimension_numbers<[1], [0], [0], [1], [0, 0, 1, 1], [], []>} : vector<32x108xf32>, vector<108x512xf32>, vector<32x512xf32> -> vector<32x512xf32>
    %c0_3 = arith.constant 0 : index
    %c0_4 = arith.constant 0 : index
    %3 = vector.load %arg3[%c0_3, %c0_4] : memref<32x1xf32, #tpu.memory_space<vmem>>, vector<32x1xf32>
    %4 = vector.broadcast %3 : vector<32x1xf32> to vector<32x512xf32>
    %5 = arith.addf %2, %4 : vector<32x512xf32>
    %6 = vector.extract_strided_slice %5 {offsets = [0, 0], sizes = [24, 512], strides = [1, 1]} : vector<32x512xf32> to vector<24x512xf32>
    %7 = arith.negf %6 : vector<24x512xf32>
    %8 = math.exp %7 : vector<24x512xf32>
    %cst_5 = arith.constant 1.000000e+00 : f32
    %9 = vector.broadcast %cst_5 : f32 to vector<24x512xf32>
    %10 = arith.addf %9, %8 : vector<24x512xf32>
    %11 = arith.divf %9, %10 : vector<24x512xf32>
    %12 = vector.extract_strided_slice %5 {offsets = [24, 0], sizes = [8, 512], strides = [1, 1]} : vector<32x512xf32> to vector<8x512xf32>
    %13 = math.tanh %12 : vector<8x512xf32>
    %14 = vector.extract_strided_slice %11 {offsets = [0, 0], sizes = [8, 512], strides = [1, 1]} : vector<24x512xf32> to vector<8x512xf32>
    %15 = vector.extract_strided_slice %11 {offsets = [8, 0], sizes = [8, 512], strides = [1, 1]} : vector<24x512xf32> to vector<8x512xf32>
    %16 = vector.extract_strided_slice %11 {offsets = [16, 0], sizes = [8, 512], strides = [1, 1]} : vector<24x512xf32> to vector<8x512xf32>
    %c0_6 = arith.constant 0 : index
    %c0_7 = arith.constant 0 : index
    %17 = vector.load %arg4[%c0_6, %c0_7] : memref<8x512xf32, #tpu.memory_space<vmem>>, vector<8x512xf32>
    %18 = arith.mulf %15, %17 : vector<8x512xf32>
    %19 = arith.mulf %14, %13 : vector<8x512xf32>
    %20 = arith.addf %18, %19 : vector<8x512xf32>
    %21 = math.tanh %20 : vector<8x512xf32>
    %22 = arith.mulf %16, %21 : vector<8x512xf32>
    %c0_8 = arith.constant 0 : index
    %c0_9 = arith.constant 0 : index
    %23 = vector.load %arg5[%c0_8, %c0_9] : memref<8x512xf32, #tpu.memory_space<vmem>>, vector<8x512xf32>
    tpu.vector_store %arg5[%c0_8, %c0_9], %22 {strides = array<i32>} : memref<8x512xf32, #tpu.memory_space<vmem>>, vector<8x512xf32>,
    %c0_10 = arith.constant 0 : index
    %c0_11 = arith.constant 0 : index
    %24 = vector.load %arg6[%c0_10, %c0_11] : memref<8x512xf32, #tpu.memory_space<vmem>>, vector<8x512xf32>
    tpu.vector_store %arg6[%c0_10, %c0_11], %20 {strides = array<i32>} : memref<8x512xf32, #tpu.memory_space<vmem>>, vector<8x512xf32>,
    return
  }
  func.func @transform_0(%arg0: i32) -> (i32, i32) {
    %c0_i32 = arith.constant 0 : i32
    %c0_i32_0 = arith.constant 0 : i32
    %c0_i32_1 = arith.constant 0 : i32
    return %c0_i32, %c0_i32_0 : i32, i32
  }
  func.func @transform_1(%arg0: i32) -> (i32, i32) {
    %c0_i32 = arith.constant 0 : i32
    %c0_i32_0 = arith.constant 0 : i32
    %c0_i32_1 = arith.constant 0 : i32
    return %c0_i32, %c0_i32_0 : i32, i32
  }
  func.func @transform_2(%arg0: i32) -> (i32, i32) {
    %c0_i32 = arith.constant 0 : i32
    %c0_i32_0 = arith.constant 0 : i32
    %c0_i32_1 = arith.constant 0 : i32
    return %c0_i32, %c0_i32_0 : i32, i32
  }
  func.func @transform_3(%arg0: i32) -> (i32, i32) {
    %c0_i32 = arith.constant 0 : i32
    %c0_i32_0 = arith.constant 0 : i32
    %c0_i32_1 = arith.constant 0 : i32
    return %c0_i32, %c0_i32_0 : i32, i32
  }
  func.func @transform_4(%arg0: i32) -> (i32, i32) {
    %c0_i32 = arith.constant 0 : i32
    %c0_i32_0 = arith.constant 0 : i32
    %c0_i32_1 = arith.constant 0 : i32
    return %c0_i32, %c0_i32_0 : i32, i32
  }
  func.func @transform_5(%arg0: i32) -> (i32, i32) {
    %c0_i32 = arith.constant 0 : i32
    %c0_i32_0 = arith.constant 0 : i32
    %c0_i32_1 = arith.constant 0 : i32
    return %c0_i32, %c0_i32_0 : i32, i32
  }
}

</mosaic_0001>

<bundles_post_ra>
// kernel: conv_lstm_cell_nchw.1
= control target key start
LH: loop header
LB: loop body
LE: loop exit
PB: predicated region body
PF: predicated region fallthrough
CT: control target
= control target key end

     0   :  { %v576_v3 = vmov 0.0   ;;  %v577_v8 = vmov 0   ;;  %vm116_vm0 = vcmask 1043456   ;;  %vm578_vm1 = vmmov 1   ;;  %s866_s0 = inlined_call_operand.vmem [shape: f32[108,512], index: 0, kind: input, shape index: {}]   ;;  %s867_s2 = inlined_call_operand.vmem [shape: f32[32,1], index: 2, kind: input, shape index: {}]   ;;  %s868_s1 = inlined_call_operand.vmem [shape: f32[32,108], index: 1, kind: input, shape index: {}]   ;;  %s869_s3 = inlined_call_operand.vmem [shape: f32[8,512], index: 3, kind: input, shape index: {}, may-alias: {3,5}]   ;;  %s870_s5 = inlined_call_operand.vmem [shape: f32[8,512], index: 5, kind: output, shape index: {1}, may-alias: {3,5}]   ;;  %s871_s4 = inlined_call_operand.vmem [shape: f32[8,512], index: 4, kind: output, shape index: {0}]  }
   0x1   :  { %v24_v0 = vld [vmem:[%s866_s0 + $0x8] sm:$0xff]  ;;  %v26_v2 = vld [vmem:[%s866_s0 + $0x18] sm:$0xff]  ;;  %193 = vmatprep.mubr.f32.mxu0 %v576_v3  ;;  %282 = vmatprep.mubr.f32.mxu1 %v576_v3  ;;  %v23_v6 = vld [vmem:[%s866_s0] sm:$0xff]  ;;  %vm103_vm3 = vcmask 883712  }
   0x2   :  { %v28_v1 = vld [vmem:[%s866_s0 + $0x28] sm:$0xff]  ;;  %v30_v5 = vld [vmem:[%s866_s0 + $0x38] sm:$0xff]  ;;  %v27_v7 = vld [vmem:[%s866_s0 + $0x20] sm:$0xff]  ;;  %510 = vset.pattern.permute.xlu0 %v577_v8  ;;  %511 = vset.pattern.permute.xlu1 %v577_v8 }
   0x3   :  { %v447_v4 = vpack.c.bf16 %v28_v1, %v24_v0  ;;  %v477_v9 = vpack.c.bf16 %v30_v5, %v26_v2  ;;  %v449_v10 = vpack.c.bf16 %v27_v7, %v23_v6  ;;  %v25_v11 = vld [vmem:[%s866_s0 + $0x10] sm:$0xff]  ;;  %v32_v13 = vld [vmem:[%s866_s0 + $0x48] sm:$0xff]  ;;  %v34_v16 = vld [vmem:[%s866_s0 + $0x58] sm:$0xff] }
   0x4   :  { %v29_v12 = vld [vmem:[%s866_s0 + $0x30] sm:$0xff]  ;;  %v36_v15 = vld [vmem:[%s866_s0 + $0x68] sm:$0xff]  ;;  %v38_v17 = vld [vmem:[%s866_s0 + $0x78] sm:$0xff] }
   0x5   :  { %448 = vmatprep.subr.bf16.mxu0 %v447_v4  ;;  %v479_v14 = vpack.c.bf16 %v29_v12, %v25_v11  ;;  %478 = vmatprep.subr.bf16.mxu1 %v477_v9  ;;  %v451_v18 = vpack.c.bf16 %v36_v15, %v32_v13  ;;  %v481_v19 = vpack.c.bf16 %v38_v17, %v34_v16  ;;  %v31_v20 = vld [vmem:[%s866_s0 + $0x40] sm:$0xff]  ;;  %v33_v22 = vld [vmem:[%s866_s0 + $0x50] sm:$0xff]  ;;  %v40_v25 = vld [vmem:[%s866_s0 + $0x88] sm:$0xff] }
   0x6   :  { %450 = vmatpush1.bf16.msra.mxu0 %v449_v10  ;;  %v35_v21 = vld [vmem:[%s866_s0 + $0x60] sm:$0xff]  ;;  %v37_v24 = vld [vmem:[%s866_s0 + $0x70] sm:$0xff]  ;;  %v44_v26 = vld [vmem:[%s866_s0 + $0xa8] sm:$0xff] }
   0x7   :  { %480 = vmatpush1.bf16.msra.mxu1 %v479_v14  ;;  %v453_v23 = vpack.c.bf16 %v35_v21, %v31_v20  ;;  %452 = vmatprep.subr.bf16.mxu0 %v451_v18  ;;  %v483_v27 = vpack.c.bf16 %v37_v24, %v33_v22  ;;  %v455_v28 = vpack.c.bf16 %v44_v26, %v40_v25  ;;  %v42_v29 = vld [vmem:[%s866_s0 + $0x98] sm:$0xff]  ;;  %v39_v31 = vld [vmem:[%s866_s0 + $0x80] sm:$0xff]  ;;  %v41_v34 = vld [vmem:[%s866_s0 + $0x90] sm:$0xff] }
   0x8   :  { %482 = vmatprep.subr.bf16.mxu1 %v481_v19  ;;  %v46_v30 = vld [vmem:[%s866_s0 + $0xb8] sm:$0xff]  ;;  %v43_v33 = vld [vmem:[%s866_s0 + $0xa0] sm:$0xff]  ;;  %v45_v35 = vld [vmem:[%s866_s0 + $0xb0] sm:$0xff] }
   0x9   :  { %v485_v32 = vpack.c.bf16 %v46_v30, %v42_v29  ;;  %v457_v36 = vpack.c.bf16 %v43_v33, %v39_v31  ;;  %v48_v37 = vld [vmem:[%s866_s0 + $0xc8] sm:$0xff]  ;;  %v50_v39 = vld [vmem:[%s866_s0 + $0xd8] sm:$0xff]  ;;  %v487_v40 = vpack.c.bf16 %v45_v35, %v41_v34  ;;  %v47_v43 = vld [vmem:[%s866_s0 + $0xc0] sm:$0xff] }
   0xa   :  { %454 = vmatpush1.bf16.msra.mxu0 %v453_v23  ;;  %v52_v38 = vld [vmem:[%s866_s0 + $0xe8] sm:$0xff]  ;;  %v54_v42 = vld [vmem:[%s866_s0 + $0xf8] sm:$0xff]  ;;  %v51_v44 = vld [vmem:[%s866_s0 + $0xe0] sm:$0xff] }
   0xb   :  { %484 = vmatpush1.bf16.msra.mxu1 %v483_v27  ;;  %456 = vmatprep.subr.bf16.mxu0 %v455_v28  ;;  %v459_v41 = vpack.c.bf16 %v52_v38, %v48_v37  ;;  %v489_v45 = vpack.c.bf16 %v54_v42, %v50_v39  ;;  %v49_v46 = vld [vmem:[%s866_s0 + $0xd0] sm:$0xff]  ;;  %v56_v48 = vld [vmem:[%s866_s0 + $0x108] sm:$0xff]  ;;  %v58_v50 = vld [vmem:[%s866_s0 + $0x118] sm:$0xff]  ;;  %v461_v52 = vpack.c.bf16 %v51_v44, %v47_v43 }
   0xc   :  { %486 = vmatprep.subr.bf16.mxu1 %v485_v32  ;;  %v53_v47 = vld [vmem:[%s866_s0 + $0xf0] sm:$0xff]  ;;  %v60_v49 = vld [vmem:[%s866_s0 + $0x128] sm:$0xff]  ;;  %v62_v51 = vld [vmem:[%s866_s0 + $0x138] sm:$0xff] }
   0xd   :  { %v491_v53 = vpack.c.bf16 %v53_v47, %v49_v46  ;;  %v463_v54 = vpack.c.bf16 %v60_v49, %v56_v48  ;;  %v55_v55 = vld [vmem:[%s866_s0 + $0x100] sm:$0xff]  ;;  %v57_v57 = vld [vmem:[%s866_s0 + $0x110] sm:$0xff]  ;;  %v493_v58 = vpack.c.bf16 %v62_v51, %v58_v50  ;;  %v64_v60 = vld [vmem:[%s866_s0 + $0x148] sm:$0xff] }
   0xe   :  { %458 = vmatpush1.bf16.msra.mxu0 %v457_v36  ;;  %v59_v56 = vld [vmem:[%s866_s0 + $0x120] sm:$0xff]  ;;  %v61_v59 = vld [vmem:[%s866_s0 + $0x130] sm:$0xff]  ;;  %v68_v61 = vld [vmem:[%s866_s0 + $0x168] sm:$0xff] }
   0xf   :  { %488 = vmatpush1.bf16.msra.mxu1 %v487_v40  ;;  %460 = vmatprep.subr.bf16.mxu0 %v459_v41  ;;  %v66_v62 = vld [vmem:[%s866_s0 + $0x158] sm:$0xff]  ;;  %v465_v0 = vpack.c.bf16 %v59_v56, %v55_v55  ;;  %v495_v1 = vpack.c.bf16 %v61_v59, %v57_v57  ;;  %v467_v2 = vpack.c.bf16 %v68_v61, %v64_v60  ;;  %v63_v4 = vld [vmem:[%s866_s0 + $0x140] sm:$0xff]  ;;  %v65_v6 = vld [vmem:[%s866_s0 + $0x150] sm:$0xff] }
  0x10   :  { %490 = vmatprep.subr.bf16.mxu1 %v489_v45  ;;  %v70_v63 = vld [vmem:[%s866_s0 + $0x178] sm:$0xff]  ;;  %v67_v5 = vld [vmem:[%s866_s0 + $0x160] sm:$0xff]  ;;  %v69_v8 = vld [vmem:[%s866_s0 + $0x170] sm:$0xff] }
  0x11   :  { %v497_v7 = vpack.c.bf16 %v70_v63, %v66_v62  ;;  %v72_v9 = vld [vmem:[%s866_s0 + $0x188] sm:$0xff]  ;;  %v74_v11 = vld [vmem:[%s866_s0 + $0x198] sm:$0xff]  ;;  %v469_v13 = vpack.c.bf16 %v67_v5, %v63_v4  ;;  %v79_v14 = vld [vmem:[%s867_s2] sm:$0xff]  ;;  %v499_v15 = vpack.c.bf16 %v69_v8, %v65_v6 }
  0x12   :  { %462 = vmatpush1.bf16.msra.mxu0 %v461_v52  ;;  %v76_v10 = vld [vmem:[%s866_s0 + $0x1a8] sm:$0xf]  ;;  %v78_v12 = vld [vmem:[%s866_s0 + $0x1b8] sm:$0xf]  ;;  %v71_v17 = vld [vmem:[%s866_s0 + $0x180] sm:$0xff]  ;;  %85 = vperm.xlu0 %510, %v79_v14  }
  0x13   :  { %492 = vmatpush1.bf16.msra.mxu1 %v491_v53  ;;  %464 = vmatprep.subr.bf16.mxu0 %v463_v54  ;;  %v471_v16 = vpack.c.bf16 %v76_v10, %v72_v9  ;;  %v75_v18 = vld [vmem:[%s866_s0 + $0x1a0] sm:$0xf]  ;;  %v81_v19 = vld [vmem:[%s867_s2 + $0x10] sm:$0xff]  ;;  %vm780_vm2 = vmpackc.low %vm116_vm0, %vm578_vm1  ;;  %v501_v21 = vpack.c.bf16 %v78_v12, %v74_v11 }
  0x14   :  { %494 = vmatprep.subr.bf16.mxu1 %v493_v58  ;;  %v73_v22 = vld [vmem:[%s866_s0 + $0x190] sm:$0xff]  ;;  %v80_v24 = vld [vmem:[%s867_s2 + $0x8] sm:$0xff]  ;;  %95 = vperm.xlu1 %511, %v81_v19   ;;  %v474_v25 = vpack.c.bf16 %v75_v18, %v71_v17  ;;  %v82_v26 = vld [vmem:[%s867_s2 + $0x18] sm:$0xff] }
  0x15   :  { %v77_v23 = vld [vmem:[%s866_s0 + $0x1b0] sm:$0xf]  ;;  %v19_v28 = vld [vmem:[%s868_s1] sm:$0xff]  ;;  %v20_v29 = vld [vmem:[%s868_s1 + $0x8] sm:$0xff] }
  0x16   :  { %466 = vmatpush1.bf16.msra.mxu0 %v465_v0  ;;  %v504_v27 = vpack.c.bf16 %v77_v23, %v73_v22  ;;  %90 = vperm.xlu0 %510, %v80_v24   ;;  %v21_v30 = vld [vmem:[%s868_s1 + $0x10] sm:$0xff]  ;;  %v22_v31 = vld [vmem:[%s868_s1 + $0x18] sm:$0xff] }
  0x17   :  { %496 = vmatpush1.bf16.msra.mxu1 %v495_v1  ;;  %468 = vmatprep.subr.bf16.mxu0 %v467_v2 }
  0x18   :  { %498 = vmatprep.subr.bf16.mxu1 %v497_v7  ;;  %100 = vperm.xlu1 %511, %v82_v26  }
  0x1a   :  { %470 = vmatpush1.bf16.msra.mxu0 %v469_v13 }
  0x1b   :  { %500 = vmatpush1.bf16.msra.mxu1 %v499_v15  ;;  %473 = vmatprep.subr.msk.bf16.mxu0 %vm780_vm2, %v471_v16 }
  0x1c   :  { %503 = vmatprep.subr.msk.bf16.mxu1 %vm780_vm2, %v501_v21 }
  0x1e   :  { %476 = vmatpush1.bf16.msk.msra.mxu0 %vm780_vm2, %v474_v25 }
  0x1f   :  { %506 = vmatpush1.bf16.msk.msra.mxu1 %vm780_vm2, %v504_v27 }
  0x21   :  { %425 = vmatmul.mubr.msk.f32.vlgmr.msra.gmra.mrb[0].mxu0 %vm103_vm3, %v19_v28 }
  0x22   :  { %431 = vmatmul.mubr.msk.f32.vlgmr.msra.gmra.mrb[0].mxu1 %vm103_vm3, %v19_v28  ;;  %199 = vmatprep.mubr.f32.mxu0 %v576_v3 }
  0x23   :  { %288 = vmatprep.mubr.f32.mxu1 %v576_v3 }
  0x25   :  { %426 = vmatmul.mubr.msk.f32.gmra.mrb[2].mxu0 %vm103_vm3, %v20_v29 }
  0x26   :  { %432 = vmatmul.mubr.msk.f32.gmra.mrb[2].mxu1 %vm103_vm3, %v20_v29  ;;  %205 = vmatprep.mubr.f32.mxu0 %v576_v3 }
  0x27   :  { %294 = vmatprep.mubr.f32.mxu1 %v576_v3 }
  0x29   :  { %427 = vmatmul.mubr.msk.f32.gmra.mrb[4].mxu0 %vm103_vm3, %v21_v30 }
  0x2a   :  { %433 = vmatmul.mubr.msk.f32.gmra.mrb[4].mxu1 %vm103_vm3, %v21_v30  ;;  %211 = vmatprep.mubr.f32.mxu0 %v576_v3 }
  0x2b   :  { %300 = vmatprep.mubr.f32.mxu1 %v576_v3 }
  0x2d   :  { %428 = vmatmul.mubr.msk.f32.gmra.mrb[6].mxu0 %vm103_vm3, %v22_v31 }
  0x2e   :  { %434 = vmatmul.mubr.msk.f32.gmra.mrb[6].mxu1 %vm103_vm3, %v22_v31 }
  0x91   :  { %v86_v32 = vpop.permute.xlu0 %85 }
  0x93   :  { %v96_v42 = vpop.permute.xlu1 %95 }
  0x95   :  { %v91_v44 = vpop.permute.xlu0 %90 }
  0x97   :  { %v101_v62 = vpop.permute.xlu1 %100 }
  0xf4   :  { %v195_v33 = vpop.f32.mrb[0].mxu0 }
  0xf5   :  { %v196_v34 = vadd.f32 %v195_v33, %v86_v32  ;;  %v284_v35 = vpop.f32.mrb[0].mxu1  ;;  %v197_v36 = vpop.f32.mrb[1].mxu0 }
  0xf6   :  { %v285_v37 = vadd.f32 %v284_v35, %v86_v32  ;;  %v198_v38 = vadd.f32 %v197_v36, %v86_v32  ;;  %v286_v39 = vpop.f32.mrb[1].mxu1 }
  0xf7   :  { %v435_v40 = vmul.f32 -1.442695, %v196_v34  ;;  %v287_v41 = vadd.f32 %v286_v39, %v86_v32 }
  0xf8   :  { %v437_v43 = vmul.f32 -1.442695, %v285_v37  ;;  %v436_v45 = vmul.f32 -1.442695, %v198_v38  ;;  %v201_v46 = vpop.f32.mrb[2].mxu0  ;;  %v383_v37 = vld [vmem:[%s869_s3] sm:$0xff] }
  0xf9   :  { %512 = vpow2.f32 %v435_v40  ;;  %v438_v3 = vmul.f32 -1.442695, %v287_v41  ;;  %v202_v47 = vadd.f32 %v201_v46, %v91_v44  ;;  %v290_v48 = vpop.f32.mrb[2].mxu1  ;;  %v203_v49 = vpop.f32.mrb[3].mxu0 }
  0xfa   :  { %514 = vpow2.f32 %v437_v43  ;;  %v291_v50 = vadd.f32 %v290_v48, %v91_v44  ;;  %v204_v51 = vadd.f32 %v203_v49, %v91_v44  ;;  %v292_v52 = vpop.f32.mrb[3].mxu1  ;;  %v384_v48 = vld [vmem:[%s869_s3 + $0x8] sm:$0xff] }
  0xfb   :  { %516 = vpow2.f32 %v436_v45  ;;  %v439_v53 = vmul.f32 -1.442695, %v202_v47  ;;  %v293_v54 = vadd.f32 %v292_v52, %v91_v44 }
  0xfc   :  { %518 = vpow2.f32 %v438_v3  ;;  %v441_v55 = vmul.f32 -1.442695, %v291_v50  ;;  %v440_v56 = vmul.f32 -1.442695, %v204_v51  ;;  %v207_v57 = vpop.f32.mrb[4].mxu0  ;;  %v385_v3 = vld [vmem:[%s869_s3 + $0x10] sm:$0xff] }
  0xfd   :  { %520 = vpow2.f32 %v439_v53  ;;  %v442_v58 = vmul.f32 -1.442695, %v293_v54  ;;  %v296_v59 = vpop.f32.mrb[4].mxu1  ;;  %v209_v60 = vpop.f32.mrb[5].mxu0  ;;  %v208_v63 = vadd.f32 %v207_v57, %v96_v42 }
  0xfe   :  { %522 = vpow2.f32 %v441_v55  ;;  %v298_v61 = vpop.f32.mrb[5].mxu1  ;;  %v297_v0 = vadd.f32 %v296_v59, %v96_v42  ;;  %v210_v2 = vadd.f32 %v209_v60, %v96_v42 }
  0xff   :  { %524 = vpow2.f32 %v440_v56  ;;  %v443_v9 = vmul.f32 -1.442695, %v208_v63  ;;  %v299_v10 = vadd.f32 %v298_v61, %v96_v42 }
 0x100   :  { %526 = vpow2.f32 %v442_v58  ;;  %v213_v1 = vpop.f32.mrb[6].mxu0  ;;  %v445_v13 = vmul.f32 -1.442695, %v297_v0  ;;  %v444_v15 = vmul.f32 -1.442695, %v210_v2 }
 0x101   :  { %v214_v4 = vadd.f32 %v213_v1, %v101_v62  ;;  %v302_v5 = vpop.f32.mrb[6].mxu1  ;;  %v215_v6 = vpop.f32.mrb[7].mxu0  ;;  %v446_v18 = vmul.f32 -1.442695, %v299_v10 }
 0x102   :  { %v304_v7 = vpop.f32.mrb[7].mxu1  ;;  %v303_v29 = vadd.f32 %v302_v5, %v101_v62  ;;  %v216_v31 = vadd.f32 %v215_v6, %v101_v62 }
 0x103   :  { %v513_v8 = vpop.eup %512  ;;  %528 = vtanh.f32 %v214_v4  ;;  %v305_v33 = vadd.f32 %v304_v7, %v101_v62 }
 0x104   :  { %v515_v11 = vpop.eup %514  ;;  %v343_v12 = vadd.f32 1.0, %v513_v8 }
 0x105   :  { %v517_v14 = vpop.eup %516  ;;  %v345_v20 = vadd.f32 1.0, %v515_v11 }
 0x106   :  { %v519_v16 = vpop.eup %518  ;;  %530 = vrcp.f32 %v343_v12  ;;  %v344_v23 = vadd.f32 1.0, %v517_v14 }
 0x107   :  { %v521_v17 = vpop.eup %520  ;;  %532 = vpow2.f32 %v443_v9  ;;  %v346_v28 = vadd.f32 1.0, %v519_v16 }
 0x108   :  { %v523_v19 = vpop.eup %522  ;;  %v347_v21 = vadd.f32 1.0, %v521_v17  ;;  %534 = vpow2.f32 %v445_v13 }
 0x109   :  { %v525_v22 = vpop.eup %524  ;;  %536 = vpow2.f32 %v444_v15  ;;  %v349_v25 = vadd.f32 1.0, %v523_v19 }
 0x10a   :  { %v527_v24 = vpop.eup %526  ;;  %538 = vrcp.f32 %v347_v21  ;;  %v348_v26 = vadd.f32 1.0, %v525_v22 }
 0x10b   :  { %540 = vpow2.f32 %v446_v18  ;;  %v350_v27 = vadd.f32 1.0, %v527_v24 }
 0x10c   :  { %542 = vrcp.f32 %v345_v20 }
 0x10d   :  { %544 = vrcp.f32 %v344_v23  ;;  %v529_v30 = vpop.eup %528 }
 0x10e   :  { %546 = vrcp.f32 %v349_v25 }
 0x10f   :  { %548 = vrcp.f32 %v348_v26 }
 0x110   :  { %v531_v32 = vpop.eup %530  ;;  %550 = vrcp.f32 %v350_v27 }
 0x111   :  { %v533_v34 = vpop.eup %532  ;;  %552 = vrcp.f32 %v346_v28  ;;  %v391_v35 = vmul.f32 %v531_v32, %v529_v30 }
 0x112   :  { %v535_v36 = vpop.eup %534  ;;  %554 = vtanh.f32 %v303_v29  ;;  %v351_v40 = vadd.f32 1.0, %v533_v34 }
 0x113   :  { %v537_v38 = vpop.eup %536  ;;  %556 = vtanh.f32 %v216_v31  ;;  %v353_v51 = vadd.f32 1.0, %v535_v36 }
 0x114   :  { %v539_v39 = vpop.eup %538  ;;  %558 = vtanh.f32 %v305_v33  ;;  %v352_v54 = vadd.f32 1.0, %v537_v38 }
 0x115   :  { %v541_v41 = vpop.eup %540  ;;  %v387_v42 = vmul.f32 %v539_v39, %v383_v37  ;;  %560 = vrcp.f32 %v351_v40 }
 0x116   :  { %v543_v43 = vpop.eup %542  ;;  %v354_v57 = vadd.f32 1.0, %v541_v41 }
 0x117   :  { %v545_v44 = vpop.eup %544  ;;  %v395_v45 = vadd.f32 %v391_v35, %v387_v42 }
 0x118   :  { %v547_v46 = vpop.eup %546 }
 0x119   :  { %v549_v47 = vpop.eup %548  ;;  %562 = vtanh.f32 %v395_v45  ;;  %411 = vst [vmem:[%s870_s5] sm:$0xff] %v395_v45  ;;  %v389_v53 = vmul.f32 %v547_v46, %v385_v3 }
 0x11a   :  { %v551_v49 = vpop.eup %550  ;;  %v388_v56 = vmul.f32 %v549_v47, %v384_v48  ;;  %564 = vrcp.f32 %v353_v51 }
 0x11b   :  { %v553_v52 = vpop.eup %552  ;;  %566 = vrcp.f32 %v352_v54 }
 0x11c   :  { %v555_v55 = vpop.eup %554  ;;  %568 = vrcp.f32 %v354_v57 }
 0x11d   :  { %v557_v58 = vpop.eup %556  ;;  %v393_v60 = vmul.f32 %v555_v55, %v543_v43 }
 0x11e   :  { %v559_v61 = vpop.eup %558  ;;  %v392_v62 = vmul.f32 %v557_v58, %v545_v44 }
 0x11f   :  { %v397_v63 = vadd.f32 %v393_v60, %v389_v53  ;;  %v394_v0 = vmul.f32 %v559_v61, %v553_v52  ;;  %v561_v4 = vpop.eup %560 }
 0x120   :  { %v386_v50 = vld [vmem:[%s869_s3 + $0x18] sm:$0xff]  ;;  %v396_v1 = vadd.f32 %v392_v62, %v388_v56 }
 0x121   :  { %v390_v59 = vmul.f32 %v551_v49, %v386_v50  ;;  %570 = vtanh.f32 %v397_v63  ;;  %413 = vst [vmem:[%s870_s5 + $0x10] sm:$0xff] %v397_v63 }
 0x122   :  { %572 = vtanh.f32 %v396_v1  ;;  %412 = vst [vmem:[%s870_s5 + $0x8] sm:$0xff] %v396_v1 }
 0x123   :  { %v398_v2 = vadd.f32 %v394_v0, %v390_v59  ;;  %v563_v5 = vpop.eup %562 }
 0x124   :  { %v403_v6 = vmul.f32 %v563_v5, %v561_v4  ;;  %v565_v7 = vpop.eup %564 }
 0x125   :  { %574 = vtanh.f32 %v398_v2  ;;  %414 = vst [vmem:[%s870_s5 + $0x18] sm:$0xff] %v398_v2  ;;  %v567_v8 = vpop.eup %566 }
 0x126   :  { %407 = vst [vmem:[%s871_s4] sm:$0xff] %v403_v6  ;;  %v569_v9 = vpop.eup %568 }
 0x12b   :  { %v571_v10 = vpop.eup %570 }
 0x12c   :  { %v573_v11 = vpop.eup %572  ;;  %v405_v12 = vmul.f32 %v571_v10, %v565_v7 }
 0x12d   :  { %v404_v14 = vmul.f32 %v573_v11, %v567_v8 }
 0x12e   :  { %409 = vst [vmem:[%s871_s4 + $0x10] sm:$0xff] %v405_v12 }
 0x12f   :  { %v575_v13 = vpop.eup %574  ;;  %408 = vst [vmem:[%s871_s4 + $0x8] sm:$0xff] %v404_v14 }
 0x130   :  { %v406_v15 = vmul.f32 %v575_v13, %v569_v9 }
 0x132   :  { %410 = vst [vmem:[%s871_s4 + $0x18] sm:$0xff] %v406_v15 }

</bundles_post_ra>
